<compile_context>
chip_gen: v7x
topology: tpu7x:2x2x1
jax: 0.10.0
libtpu: 0.0.40
codegen_flags: <defaults>
</compile_context>

<pallas_src>
import jax
import jax.numpy as jnp
from jax.experimental import pallas as pl
from jax.experimental.pallas import tpu as pltpu


def _vmem_limit_bytes():
    """~75% of physical per-core VMEM (48 MiB on v7x, 96 MiB on v5e/v6e)."""
    cap = 64 * 1024 * 1024  # conservative fallback = v7x per-core physical VMEM
    try:
        info = pltpu.get_tpu_info()
        c = int(getattr(info, "vmem_capacity_bytes", 0))
        if c > 0:
            cap = c
    except Exception:
        pass
    return (cap * 3) // 4


def _choose_tiling(n, f, x_itemsize, vmem_limit_bytes):
    """Pick (tile_n, tile_f).

    Per-batch-row VMEM accounting (lane-padded where applicable):
      x double-buffer:   2 * tile_f * x_itemsize
      out double-buffer: 2 * 128 * 4   ((tile_n, 1) f32 lane-padded to 128 lanes)
      acc scratch:           128 * 4
    """
    usable = max(vmem_limit_bytes - 6 * 1024 * 1024, 2 * 1024 * 1024)
    MAX_TILE_N = 16384                  # step overhead is well amortized before this
    MIN_TILE_N_BEFORE_F_SPLIT = 1024

    def rows_for(tf):
        per_row = 2 * tf * x_itemsize + 3 * 128 * 4
        return max(8, (usable // per_row) // 8 * 8)

    tile_f = f
    tile_n = rows_for(tile_f)
    if tile_n < MIN_TILE_N_BEFORE_F_SPLIT and f > 128:
        # Feature axis too wide for a well-amortized batch tile: split F across a
        # second ("arbitrary") grid axis with an accumulator.
        per_row_target = usable // MIN_TILE_N_BEFORE_F_SPLIT
        tf = (per_row_target - 3 * 128 * 4) // (2 * x_itemsize)
        tile_f = min(f, max(128, (tf // 128) * 128))
        tile_n = rows_for(tile_f)

    tile_n = min(tile_n, MAX_TILE_N)

    n_pad8 = ((n + 7) // 8) * 8
    tile_n = min(tile_n, n_pad8)
    # Keep >= 2 batch tiles when the batch is big enough, so v7x's two TensorCores
    # both get work (pure no-op cost on single-TC v5e/v6e).
    if tile_n >= n_pad8 and n_pad8 >= 16:
        tile_n = max(8, ((n_pad8 // 2 + 7) // 8) * 8)
    return tile_n, tile_f


def _make_logreg_kernel(f_total, tile_f, mask_last_f_block):
    def kernel(x_ref, w_ref, b_ref, o_ref, acc_ref):
        # x_ref: (tile_n, tile_f) VMEM   w_ref: (1, tile_f) VMEM
        # b_ref: (1,) SMEM               o_ref: (tile_n, 1) VMEM
        # acc_ref: (tile_n, 1) f32 VMEM scratch (persists across the F grid axis)
        k = pl.program_id(1)

        @pl.when(k == 0)
        def _init():
            acc_ref[...] = jnp.zeros_like(acc_ref)

        x = x_ref[...].astype(jnp.float32)   # bf16 inputs upcast right after the load
        w = w_ref[...].astype(jnp.float32)   # broadcasts over rows
        prod = x * w
        if mask_last_f_block:
            # Partial feature block at the boundary: zero garbage columns so they
            # cannot pollute the per-row sum (NaN * 0 would).
            col = jax.lax.broadcasted_iota(jnp.int32, prod.shape, 1) + k * tile_f
            prod = jnp.where(col < f_total, prod, 0.0)
        # VPU multiply + XLU lane reduce -> (tile_n, 1) partial logits.
        acc_ref[...] += jnp.sum(prod, axis=-1, keepdims=True)

        @pl.when(k == pl.num_programs(1) - 1)
        def _finalize():
            # Output HBM bytes are ~F x smaller than the x reads, so the masked
            # (tile_n, 1) lane store is negligible for the HBM-bound roofline.
            # TODO(synk): lane-dense (1, tile_n) output block (relayout the reduce
            # result on the XLU) would shrink output VMEM ~128x and use full vst.
            o_ref[...] = jax.nn.sigmoid(acc_ref[...] + b_ref[0]).astype(o_ref.dtype)

    return kernel


def logistic_regression(x, weight, bias, *, tile_n=None, tile_f=None):
    """x: (N, F) f32 or bf16; weight: (1, F) (PyTorch nn.Linear layout); bias: (1,)."""
    n, f = x.shape
    assert weight.shape == (1, f)
    weight = weight.astype(jnp.float32)
    bias = jnp.asarray(bias).reshape(1).astype(jnp.float32)

    vmem_limit = _vmem_limit_bytes()
    auto_tn, auto_tf = _choose_tiling(n, f, jnp.dtype(x.dtype).itemsize, vmem_limit)
    if tile_n is None:
        tile_n = auto_tn
    if tile_f is None:
        tile_f = auto_tf
    tile_f = min(tile_f, f)
    assert tile_n % 8 == 0, "tile_n must be a multiple of 8"
    assert tile_f == f or tile_f % 128 == 0, "tile_f must equal F or be a multiple of 128"

    num_n = pl.cdiv(n, tile_n)
    num_f = pl.cdiv(f, tile_f)
    mask_last_f_block = (f % tile_f) != 0

    kernel = _make_logreg_kernel(f, tile_f, mask_last_f_block)

    out = pl.pallas_call(
        kernel,
        out_shape=jax.ShapeDtypeStruct((n, 1), jnp.float32),
        grid_spec=pltpu.PrefetchScalarGridSpec(
            num_scalar_prefetch=0,
            grid=(num_n, num_f),
            in_specs=[
                # Streamed, double-buffered x tiles (partial boundary blocks allowed).
                pl.BlockSpec((tile_n, tile_f), lambda i, k: (i, k)),
                # Lane-major weight slice; same block across the batch axis.
                pl.BlockSpec((1, tile_f), lambda i, k: (0, k)),
                # Bias scalar lives in SMEM.
                pl.BlockSpec(memory_space=pltpu.MemorySpace.SMEM),
            ],
            out_specs=pl.BlockSpec((tile_n, 1), lambda i, k: (i, 0)),
            scratch_shapes=[pltpu.VMEM((tile_n, 1), jnp.float32)],
        ),
        compiler_params=pltpu.CompilerParams(
            # Batch axis parallel (v7x megacore); F axis is the reduction -> arbitrary.
            dimension_semantics=("parallel", "arbitrary"),
            vmem_limit_bytes=int(vmem_limit),
        ),
    )(x, weight, bias)
    return out


if __name__ == "__main__":
    key = jax.random.PRNGKey(0)
    kx, kw, kb = jax.random.split(key, 3)

    # --- Main example: nn.Linear(32, 1) + sigmoid on a small batch -------------------
    n_samples, n_features = 8, 32
    x = jax.random.normal(kx, (n_samples, n_features), dtype=jnp.float32)
    bound = 1.0 / jnp.sqrt(jnp.float32(n_features))
    weight = jax.random.uniform(kw, (1, n_features), minval=-bound, maxval=bound,
                                dtype=jnp.float32)
    bias = jax.random.uniform(kb, (1,), minval=-bound, maxval=bound, dtype=jnp.float32)

    y = logistic_regression(x, weight, bias)
    jax.block_until_ready(y)
    y_ref = jax.nn.sigmoid(x @ weight.T + bias)
    assert y.shape == (n_samples, 1)
    assert jnp.allclose(y, y_ref, atol=1e-6, rtol=1e-6)

    # --- Tiled batch with a partial last tile (no host-side padding) -----------------
    n2, f2 = 200, 128
    x2 = jax.random.normal(jax.random.fold_in(kx, 1), (n2, f2), dtype=jnp.float32)
    w2 = jax.random.uniform(kw, (1, f2), minval=-0.1, maxval=0.1, dtype=jnp.float32)
    y2 = logistic_regression(x2, w2, bias, tile_n=64)
    jax.block_until_ready(y2)
    y2_ref = jax.nn.sigmoid(x2 @ w2.T + bias)
    assert y2.shape == (n2, 1)
    assert jnp.allclose(y2, y2_ref, atol=1e-5, rtol=1e-5)

    # --- Forced F-split (accumulator path) with a partial, masked last F block -------
    n3, f3 = 96, 320
    x3 = jax.random.normal(jax.random.fold_in(kx, 2), (n3, f3), dtype=jnp.float32)
    w3 = jax.random.uniform(jax.random.fold_in(kw, 2), (1, f3), minval=-0.1, maxval=0.1,
                            dtype=jnp.float32)
    y3 = logistic_regression(x3, w3, bias, tile_n=32, tile_f=128)
    jax.block_until_ready(y3)
    y3_ref = jax.nn.sigmoid(x3 @ w3.T + bias)
    assert y3.shape == (n3, 1)
    assert jnp.allclose(y3, y3_ref, atol=1e-5, rtol=1e-5)

    # --- bf16 features, auto tiling (exercises the >=2-tile batch split) -------------
    n4, f4 = 1024, 256
    x4 = jax.random.normal(jax.random.fold_in(kx, 3), (n4, f4)).astype(jnp.bfloat16)
    w4 = jax.random.uniform(jax.random.fold_in(kw, 3), (1, f4), minval=-0.05, maxval=0.05,
                            dtype=jnp.float32)
    y4 = logistic_regression(x4, w4, bias)
    jax.block_until_ready(y4)
    y4_ref = jax.nn.sigmoid(x4.astype(jnp.float32) @ w4.T + bias)
    assert y4.shape == (n4, 1)
    assert jnp.allclose(y4, y4_ref, atol=1e-5, rtol=1e-5)

    print("KERNEL_OK")
</pallas_src>

<mosaic_0001>
module attributes {stable_mosaic.version = 11 : i64} {
  func.func @kernel(%arg0: i32, %arg1: i32, %arg2: memref<8x32xf32, #tpu.memory_space<vmem>>, %arg3: memref<1x32xf32, #tpu.memory_space<vmem>>, %arg4: memref<1xf32, #tpu.memory_space<smem>>, %arg5: memref<8x1xf32, #tpu.memory_space<vmem>>, %arg6: memref<8x1xf32, #tpu.memory_space<vmem>>) attributes {dimension_semantics = [#tpu.dimension_semantics<parallel>, #tpu.dimension_semantics<arbitrary>], iteration_bounds = array<i64: 1, 1>, scalar_prefetch = 0 : i64, scratch_operands = 1 : i64, tpu.core_type = #tpu.core_type<tc>, window_params = [{transform_indices = @transform_0, window_bounds = array<i64: 8, 32>}, {transform_indices = @transform_1, window_bounds = array<i64: 1, 32>}, {transform_indices = @transform_2, window_bounds = array<i64: 1>}, {transform_indices = @transform_3, window_bounds = array<i64: 8, 1>}]} {
    %c0_i32 = arith.constant 0 : i32
    %0 = arith.cmpi eq, %arg1, %c0_i32 : i32
    %1 = arith.extui %0 : i1 to i32
    %c0_i32_0 = arith.constant 0 : i32
    %2 = arith.cmpi ne, %1, %c0_i32_0 : i32
    scf.if %2 {
      %cst_10 = arith.constant 0.000000e+00 : f32
      %15 = vector.broadcast %cst_10 : f32 to vector<8x1xf32>
      %c0_11 = arith.constant 0 : index
      %c0_12 = arith.constant 0 : index
      %16 = vector.load %arg6[%c0_11, %c0_12] : memref<8x1xf32, #tpu.memory_space<vmem>>, vector<8x1xf32>
      tpu.vector_store %arg6[%c0_11, %c0_12], %15 {strides = array<i32>} : memref<8x1xf32, #tpu.memory_space<vmem>>, vector<8x1xf32>,
    } else {
    }
    %c0 = arith.constant 0 : index
    %c0_1 = arith.constant 0 : index
    %3 = vector.load %arg2[%c0, %c0_1] : memref<8x32xf32, #tpu.memory_space<vmem>>, vector<8x32xf32>
    %c0_2 = arith.constant 0 : index
    %c0_3 = arith.constant 0 : index
    %4 = vector.load %arg3[%c0_2, %c0_3] : memref<1x32xf32, #tpu.memory_space<vmem>>, vector<1x32xf32>
    %5 = vector.broadcast %4 : vector<1x32xf32> to vector<8x32xf32>
    %6 = arith.mulf %3, %5 : vector<8x32xf32>
    %c0_4 = arith.constant 0 : index
    %c0_5 = arith.constant 0 : index
    %7 = vector.load %arg6[%c0_4, %c0_5] : memref<8x1xf32, #tpu.memory_space<vmem>>, vector<8x1xf32>
    %cst = arith.constant dense<0.000000e+00> : vector<8xf32>
    %8 = vector.multi_reduction <add>, %6, %cst [1] : vector<8x32xf32> to vector<8xf32>
    %9 = vector.shape_cast %8 : vector<8xf32> to vector<8x1xf32>
    %10 = arith.addf %7, %9 : vector<8x1xf32>
    %c0_6 = arith.constant 0 : index
    %c0_7 = arith.constant 0 : index
    %11 = vector.load %arg6[%c0_6, %c0_7] : memref<8x1xf32, #tpu.memory_space<vmem>>, vector<8x1xf32>
    tpu.vector_store %arg6[%c0_6, %c0_7], %10 {strides = array<i32>} : memref<8x1xf32, #tpu.memory_space<vmem>>, vector<8x1xf32>,
    %c0_i32_8 = arith.constant 0 : i32
    %12 = arith.cmpi eq, %arg1, %c0_i32_8 : i32
    %13 = arith.extui %12 : i1 to i32
    %c0_i32_9 = arith.constant 0 : i32
    %14 = arith.cmpi ne, %13, %c0_i32_9 : i32
    scf.if %14 {
      %c0_10 = arith.constant 0 : index
      %c0_11 = arith.constant 0 : index
      %15 = vector.load %arg6[%c0_10, %c0_11] : memref<8x1xf32, #tpu.memory_space<vmem>>, vector<8x1xf32>
      %c0_12 = arith.constant 0 : index
      %16 = memref.load %arg4[%c0_12] : memref<1xf32, #tpu.memory_space<smem>>
      %17 = vector.broadcast %16 : f32 to vector<8x1xf32>
      %18 = arith.addf %15, %17 : vector<8x1xf32>
      %19 = arith.negf %18 : vector<8x1xf32>
      %20 = math.exp %19 : vector<8x1xf32>
      %cst_13 = arith.constant 1.000000e+00 : f32
      %21 = vector.broadcast %cst_13 : f32 to vector<8x1xf32>
      %22 = arith.addf %21, %20 : vector<8x1xf32>
      %23 = arith.divf %21, %22 : vector<8x1xf32>
      %c0_14 = arith.constant 0 : index
      %c0_15 = arith.constant 0 : index
      %24 = vector.load %arg5[%c0_14, %c0_15] : memref<8x1xf32, #tpu.memory_space<vmem>>, vector<8x1xf32>
      tpu.vector_store %arg5[%c0_14, %c0_15], %23 {strides = array<i32>} : memref<8x1xf32, #tpu.memory_space<vmem>>, vector<8x1xf32>,
    } else {
    }
    return
  }
  func.func @transform_0(%arg0: i32, %arg1: i32) -> (i32, i32) {
    %c0_i32 = arith.constant 0 : i32
    return %arg0, %arg1 : i32, i32
  }
  func.func @transform_1(%arg0: i32, %arg1: i32) -> (i32, i32) {
    %c0_i32 = arith.constant 0 : i32
    %c0_i32_0 = arith.constant 0 : i32
    return %c0_i32, %arg1 : i32, i32
  }
  func.func @transform_2(%arg0: i32, %arg1: i32) -> i32 {
    %c0_i32 = arith.constant 0 : i32
    %c0_i32_0 = arith.constant 0 : i32
    return %c0_i32 : i32
  }
  func.func @transform_3(%arg0: i32, %arg1: i32) -> (i32, i32) {
    %c0_i32 = arith.constant 0 : i32
    %c0_i32_0 = arith.constant 0 : i32
    return %arg0, %c0_i32 : i32, i32
  }
}

</mosaic_0001>

<bundles_post_ra>
// kernel: tpu_custom_call.1
= control target key start
LH: loop header
LB: loop body
LE: loop exit
PB: predicated region body
PF: predicated region fallthrough
CT: control target
= control target key end

     0   :  { %9 = vsyncpa [#allocation5], 0  ;;  %s101_s12 = smov [#allocation4]   ;;  %s147_s0 = inlined_call_operand.hbm [shape: f32[8,32], index: 0, kind: input, shape index: {}]   ;;  %s148_s1 = inlined_call_operand.vmem [shape: f32[1,32], index: 1, kind: input, shape index: {}]   ;;  %s149_s2 = inlined_call_operand.<no memory space> [shape: f32[1], index: 2, kind: input, shape index: {}]   ;;  %s150_s3 = inlined_call_operand.vmem [shape: f32[8,1], index: 3, kind: output, shape index: {}]  }
   0x1   :  { %s16_s13 = sshll.u32 %s101_s12, 4  ;;  %s77_s16 = scalar_lea.hbm %s147_s0, 128  ;;  %s17_s13 = int_to_ptr.vmem [resolvable:$true] %s16_s13 }
   0x2   :  { %p78_p0 = scmp.ne.s32.totalorder %s147_s0, %s77_s16  ;;  %p81_p1 = scmp.lt.u32.totalorder %s77_s16, %s147_s0 }
   0x4   :  { %p83_p2 = pnand %p81_p1, %p78_p0 }
   0x6   :  { %86 = shalt.err (!%p83_p2)
}
   0x7   :  { %s87_s21 = scalar_lea.vmem %s17_s13, 128  ;;  %p92_p4 = scmp.lt.s32.totalorder %s17_s13, %s17_s13 }
   0x8   :  { %p88_p3 = scmp.ne.s32.totalorder %s17_s13, %s87_s21  ;;  %p93_p5 = scmp.lt.s32.totalorder %s87_s21, %s87_s21 }
   0xa   :  { %p94_p6 = por %p93_p5, %p92_p4 }
   0xc   :  { %p95_p7 = pnand %p94_p6, %p88_p3 }
   0xe   :  { %98 = shalt.err (!%p95_p7)
}
   0xf   :  { %19 = dma.hbm_to_vmem [thread:$0]  %s147_s0, 128, %s17_s13, [#allocation5]  }
  0x10   :  { %99 = dma.done.wait [#allocation5], 128  }
  0x11   :  { %100 = vsyncadd [#allocation5], 4294967168  ;;  %vm31_vm0 = vcmask 7168   ;;  %v102_v0 = vmov 0.0   ;;  %v33_v1 = vld [vmem:[#allocation4] sm:$0xff]  ;;  %vm43_vm1 = vcmask 261120   ;;  %v55_v8 = vstv %s149_s2 }
  0x12   :  { %32 = vst.msk [vmem:[#allocation2] sm:$0xff] %vm31_vm0, %v102_v0  ;;  %v69_v2 = vld [vmem:[%s148_s1] ss:$0 sm:$0xff] }
  0x13   :  { %v41_v3 = vmul.f32 %v69_v2, %v33_v1 }
  0x15   :  { %v44_v4 = vsel %vm43_vm1, %v41_v3, 0.0 }
  0x16   :  { %45 = vadd.xlane.f32.xlu0 %v44_v4 }
  0x19   :  { %v42_v5 = vld [vmem:[#allocation2] sm:$0xff] }
  0xa3   :  { %v46_v6 = vpop.xlane.xlu0 %45 }
  0xa4   :  { %v47_v7 = vadd.f32 %v46_v6, %v42_v5 }
  0xa6   :  { %49 = vst.msk [vmem:[#allocation2] sm:$0xff] %vm31_vm0, %v47_v7 }
  0xad   :  { %v53_v9 = vld [vmem:[#allocation2] sm:$0xff] }
  0xae   :  { %v56_v10 = vadd.f32 %v55_v8, %v53_v9 }
  0xb0   :  { %v70_v11 = vmul.f32 -1.442695, %v56_v10 }
  0xb2   :  { %73 = vpow2.f32 %v70_v11 }
  0xbc   :  { %v74_v12 = vpop.eup %73 }
  0xbd   :  { %v60_v13 = vadd.f32 1.0, %v74_v12 }
  0xbf   :  { %75 = vrcp.f32 %v60_v13 }
  0xc9   :  { %v76_v14 = vpop.eup %75 }
  0xca   :  { %63 = vst.msk [vmem:[%s150_s3] sm:$0xff] %vm31_vm0, %v76_v14 }
  0xcb   :  { %68 = vsyncpa [#allocation5], 1 }

</bundles_post_ra>
